<compile_context>
chip_gen: v7x
topology: tpu7x:2x2x1
jax: 0.10.0
libtpu: 0.0.40
codegen_flags: <defaults>
</compile_context>

<pallas_src>
import jax
import jax.numpy as jnp
from jax.experimental import pallas as pl
from jax.experimental.pallas import tpu as pltpu
import numpy as np

_EPS_KABSCH = 1e-7  # eps used by kabsch_transformation_estimation in the reference repo

# ~2^-12 relative error vs. the exact divide; well inside the 5e-3 test tolerance.
# Set to False for bit-closer parity with the PyTorch reference.
_USE_APPROX_RECIPROCAL = True

_TARGET_STEP_BYTES = 4 * 1024 * 1024  # ~2-4 MiB of HBM reads per grid step (review)

# Module parameters from __init__ (unused in forward, kept for fidelity).
BETA = jnp.float32(-5.0)
ALPHA = jnp.float32(-5.0)


def _kabsch_moments_kernel(xyz_s_ref, wt_ref, w_ref, label_ref, out_ref):
    """Per-grid-step block of TB batch elements.

    Ref shapes:
      xyz_s_ref, wt_ref : (TB, 3, N)
      w_ref, label_ref  : (TB, 1, N)
      out_ref           : (TB, 3, 8) packed: lanes [0:3]=cov row, [3]=mean_s, [4]=mean_t, [5:8]=0
    """
    x1 = xyz_s_ref[...].astype(jnp.float32)      # source points   (TB, 3, N)
    x2 = wt_ref[...].astype(jnp.float32)         # "weighted_t"    (TB, 3, N)
    w = w_ref[...].astype(jnp.float32)           # (TB, 1, N)
    lab = label_ref[...].astype(jnp.float32)     # (TB, 1, N)

    # weights = weights * |label - 1|   (keep background points only)
    w = w * jnp.abs(lab - 1.0)

    # normalize_w=True branch of kabsch_transformation_estimation:
    #   wn  = w / (sum(w) + eps)
    #   swn = sum(wn) == sum(w) / (sum(w) + eps)   (algebraic -> no 2nd full-N reduction)
    sw = jnp.sum(w, axis=-1, keepdims=True)                    # (TB, 1, 1) lane reduce
    if _USE_APPROX_RECIPROCAL:
        inv_d1 = pl.reciprocal(sw + _EPS_KABSCH, approx=True)  # EUP slot (free)
    else:
        inv_d1 = 1.0 / (sw + _EPS_KABSCH)
    wn = w * inv_d1                                            # (TB, 1, N)
    swn = sw * inv_d1                                          # (TB, 1, 1)
    # NOTE: a ragged/garbage batch row (sw garbage or 0 -> inv_d1 ~ 1/eps) only produces
    # garbage in that same row; rows >= B are sliced off by the wrapper.

    # Raw first moments (single big temporary wx1, reused for the covariance).
    wx1 = x1 * wn                                              # (TB, 3, N)
    m1 = jnp.sum(wx1, axis=-1, keepdims=True)                  # (TB, 3, 1) = sum wn*x1
    m2 = jnp.sum(x2 * wn, axis=-1, keepdims=True)              # (TB, 3, 1) = sum wn*x2

    denom = swn + _EPS_KABSCH                                  # (TB, 1, 1)
    inv_denom = 1.0 / denom                                    # tiny exact divide
    mean_s = m1 * inv_denom                                    # (TB, 3, 1)
    mean_t = m2 * inv_denom                                    # (TB, 3, 1)

    # cov = sum_n wn*(x1-mean_s)(x2-mean_t)^T
    #     = C_raw - mean_s*mean_t^T*(swn + 2*eps)       (exact algebraic identity)
    # Raw-moment form avoids centered (TB,3,N) temporaries; the rank-1 correction is
    # negligible (3x3 per batch).  Mild cancellation only if |mean| >> spread (point
    # clouds are fine; accumulation is f32).
    corr = swn + 2.0 * _EPS_KABSCH                             # (TB, 1, 1)
    cols = []
    for j in range(3):                                         # column j of cov
        c_raw_j = jnp.sum(wx1 * x2[:, j:j + 1, :], axis=-1, keepdims=True)   # (TB, 3, 1)
        cols.append(c_raw_j - mean_s * mean_t[:, j:j + 1, :] * corr)
    cov = jnp.concatenate(cols, axis=-1)                       # (TB, 3, 3)

    pad = jnp.zeros((cov.shape[0], 3, 3), jnp.float32)
    # single packed store -> single (tiny) output DMA per grid step
    out_ref[...] = jnp.concatenate([cov, mean_s, mean_t, pad], axis=-1)


def _vmem_capacity_bytes():
    """Physical VMEM of the current chip; conservative fallback = v7x per-core 64 MiB."""
    try:
        info = pltpu.get_tpu_info()
        cap = int(getattr(info, "vmem_capacity_bytes", 0) or 0)
        if cap > 0:
            return cap
    except Exception:
        pass
    return 64 * 1024 * 1024


def _choose_batch_tile(B, N):
    """Padding-aware, per-generation batch-tile choice.

    VMEM accounting includes the (8,128) tile padding: each (tb,3,N) block pads its
    sublane dim 3->8 and each (tb,1,N) block pads 1->8, so one batch element of
    double-buffered inputs really costs 2 * 4 * 8 * ceil(N/128)*128 * 4 bytes
    (~4x the raw 32*N), plus the (tb,3,8) packed output.
    """
    n_pad = ((N + 127) // 128) * 128
    per_batch_vmem = 2 * (4 * 8 * n_pad * 4)     # 4 input blocks, 8 sublanes, double-buffered
    per_batch_vmem += 2 * (8 * 128 * 4)          # packed output block, padded, double-buffered

    vmem_cap = _vmem_capacity_bytes()
    vmem_limit = int(min(0.75 * vmem_cap, 100 * 1024 * 1024))   # v7x ~48 MiB, v5e/v6e ~96 MiB
    budget = vmem_limit // 2                      # headroom for Mosaic scratch / epilogue

    tb_vmem = max(1, budget // per_batch_vmem)
    tb_bw = max(1, _TARGET_STEP_BYTES // (32 * N))   # raw HBM bytes per batch element = 32*N
    tb = int(max(1, min(B, tb_vmem, tb_bw)))

    # Prefer >= 2 grid steps (pipeline overlap + v7x 2-TensorCore sharding of the
    # "parallel" batch axis) as long as per-step HBM reads stay >= ~1 MiB.
    half = -(-B // 2)
    if tb >= B and B > 1 and half * 32 * N >= (1 << 20):
        tb = half
    return tb, vmem_limit


def _kabsch_moments(xyz_s, weighted_t, weights, label):
    B, _, N = xyz_s.shape
    tb, vmem_limit = _choose_batch_tile(B, N)
    n_tiles = pl.cdiv(B, tb)
    # No jnp.pad (it was a full extra HBM pass).  If B % tb != 0, the last tile's
    # out-of-range rows read undefined data and out-of-range writes are masked by
    # Pallas; every batch row is computed independently, so valid rows are unaffected.

    flops = int(B) * int(N) * 40
    bytes_accessed = int(B) * (32 * int(N) + 3 * 8 * 4)

    packed = pl.pallas_call(
        _kabsch_moments_kernel,
        out_shape=jax.ShapeDtypeStruct((B, 3, 8), jnp.float32),
        grid_spec=pltpu.PrefetchScalarGridSpec(
            num_scalar_prefetch=0,
            grid=(n_tiles,),
            in_specs=[
                pl.BlockSpec((tb, 3, N), lambda b: (b, 0, 0)),
                pl.BlockSpec((tb, 3, N), lambda b: (b, 0, 0)),
                pl.BlockSpec((tb, 1, N), lambda b: (b, 0, 0)),
                pl.BlockSpec((tb, 1, N), lambda b: (b, 0, 0)),
            ],
            out_specs=pl.BlockSpec((tb, 3, 8), lambda b: (b, 0, 0)),
        ),
        compiler_params=pltpu.CompilerParams(
            dimension_semantics=("parallel",),
            vmem_limit_bytes=vmem_limit,
        ),
        cost_estimate=pl.CostEstimate(
            flops=flops, transcendentals=int(B), bytes_accessed=bytes_accessed),
    )(xyz_s, weighted_t, weights, label)

    cov = packed[:, :, 0:3]      # (B, 3, 3)
    mean_s = packed[:, :, 3]     # (B, 3)
    mean_t = packed[:, :, 4]     # (B, 3)
    return cov, mean_s, mean_t


def _finalize_kabsch(cov, mean_s, mean_t):
    """SVD + determinant sign fix + translation (plain JAX; 3x3 per batch).

    cov: (B,3,3), mean_s/mean_t: (B,3).
    """
    # TODO(synk): torch.svd has no Pallas primitive; batched 3x3 SVD done with
    # jnp.linalg.svd (iterative on TPU) — a closed-form 3x3 polar decomposition would
    # be faster end-to-end.
    B = cov.shape[0]
    u, s, vT = jnp.linalg.svd(cov)                 # cov = u @ diag(s) @ vT
    v = jnp.swapaxes(vT, -1, -2)                   # torch.svd returns V (not V^T)
    tm_det = jnp.linalg.det(
        jnp.matmul(jnp.swapaxes(v, -1, -2), jnp.swapaxes(u, -1, -2)))            # (B,)
    d = jnp.concatenate([jnp.ones((B, 2), cov.dtype), tm_det[:, None]], axis=1)  # (B, 3)
    det_mat = jax.vmap(jnp.diag)(d)                                              # (B, 3, 3)
    R = jnp.matmul(v, jnp.matmul(det_mat, jnp.swapaxes(u, -1, -2)))              # (B, 3, 3)
    t = mean_t[..., None] - jnp.matmul(R, mean_s[..., None])                     # (B, 3, 1)
    return R, t


def ego_motion_head_forward(xyz_s, weighted_t, weights, label):
    """Equivalent of EgoMotionHead.forward.

    Args:
      xyz_s:      (B, 3, N) source points (f32 or bf16; accumulation is f32 in-kernel)
      weighted_t: (B, 3, N) warped / weighted target points
      weights:    (B, 1, N) per-point weights
      label:      (B, 1, N) foreground label (1 = foreground, masked out)
    Returns:
      R_est: (B, 3, 3), t_est: (B, 3, 1)
    """
    cov, mean_s, mean_t = _kabsch_moments(xyz_s, weighted_t, weights, label)
    return _finalize_kabsch(cov, mean_s, mean_t)


def _reference_forward(xyz_s, weighted_t, weights, label):
    """Pure-JAX mirror of the PyTorch forward (kabsch_transformation_estimation)."""
    bg = jnp.abs(label - 1.0)
    x1 = jnp.transpose(xyz_s, (0, 2, 1))           # (B, N, 3)
    x2 = jnp.transpose(weighted_t, (0, 2, 1))      # (B, N, 3)
    w = jnp.squeeze(weights * bg, 1)               # (B, N)

    sum_w = jnp.sum(w, axis=1, keepdims=True) + _EPS_KABSCH
    w = w / sum_w
    w3 = w[..., None]                              # (B, N, 1)

    denom = jnp.sum(w3, axis=1)[:, None] + _EPS_KABSCH           # (B, 1, 1)
    x1_mean = jnp.matmul(jnp.swapaxes(w3, 1, 2), x1) / denom     # (B, 1, 3)
    x2_mean = jnp.matmul(jnp.swapaxes(w3, 1, 2), x2) / denom

    x1c = x1 - x1_mean
    x2c = x2 - x2_mean
    cov = jnp.matmul(jnp.swapaxes(x1c, 1, 2), w3 * x2c)          # (B, 3, 3)
    return _finalize_kabsch(cov, x1_mean[:, 0, :], x2_mean[:, 0, :])


if __name__ == "__main__":
    key = jax.random.PRNGKey(0)
    k1, k2, k3, k4 = jax.random.split(key, 4)

    B, N = 2, 256
    xyz_s = jax.random.normal(k1, (B, 3, N), dtype=jnp.float32)
    # target = small rigid-ish perturbation of source plus noise
    weighted_t = xyz_s + 0.05 * jax.random.normal(k2, (B, 3, N), dtype=jnp.float32)
    weights = jax.random.uniform(k3, (B, 1, N), dtype=jnp.float32, minval=0.1, maxval=1.0)
    # label: 1 = foreground (masked out), 0 = background (kept)
    label = (jax.random.uniform(k4, (B, 1, N)) < 0.3).astype(jnp.float32)

    R_est, t_est = ego_motion_head_forward(xyz_s, weighted_t, weights, label)
    jax.block_until_ready((R_est, t_est))

    R_ref, t_ref = _reference_forward(xyz_s, weighted_t, weights, label)
    np.testing.assert_allclose(np.asarray(R_est), np.asarray(R_ref), atol=5e-3, rtol=5e-3)
    np.testing.assert_allclose(np.asarray(t_est), np.asarray(t_ref), atol=5e-3, rtol=5e-3)
    assert R_est.shape == (B, 3, 3) and t_est.shape == (B, 3, 1)

    print("KERNEL_OK")
</pallas_src>

<mosaic_0001>
module attributes {stable_mosaic.version = 11 : i64} {
  func.func @_kabsch_moments_kernel(%arg0: i32, %arg1: memref<2x3x256xf32, #tpu.memory_space<vmem>>, %arg2: memref<2x3x256xf32, #tpu.memory_space<vmem>>, %arg3: memref<2x1x256xf32, #tpu.memory_space<vmem>>, %arg4: memref<2x1x256xf32, #tpu.memory_space<vmem>>, %arg5: memref<2x3x8xf32, #tpu.memory_space<vmem>>) attributes {dimension_semantics = [#tpu.dimension_semantics<parallel>], iteration_bounds = array<i64: 1>, scalar_prefetch = 0 : i64, scratch_operands = 0 : i64, tpu.core_type = #tpu.core_type<tc>, window_params = [{transform_indices = @transform_0, window_bounds = array<i64: 2, 3, 256>}, {transform_indices = @transform_1, window_bounds = array<i64: 2, 3, 256>}, {transform_indices = @transform_2, window_bounds = array<i64: 2, 1, 256>}, {transform_indices = @transform_3, window_bounds = array<i64: 2, 1, 256>}, {transform_indices = @transform_4, window_bounds = array<i64: 2, 3, 8>}]} {
    %c0 = arith.constant 0 : index
    %c0_0 = arith.constant 0 : index
    %c0_1 = arith.constant 0 : index
    %0 = vector.load %arg1[%c0, %c0_0, %c0_1] : memref<2x3x256xf32, #tpu.memory_space<vmem>>, vector<2x3x256xf32>
    %c0_2 = arith.constant 0 : index
    %c0_3 = arith.constant 0 : index
    %c0_4 = arith.constant 0 : index
    %1 = vector.load %arg2[%c0_2, %c0_3, %c0_4] : memref<2x3x256xf32, #tpu.memory_space<vmem>>, vector<2x3x256xf32>
    %c0_5 = arith.constant 0 : index
    %c0_6 = arith.constant 0 : index
    %c0_7 = arith.constant 0 : index
    %2 = vector.load %arg3[%c0_5, %c0_6, %c0_7] : memref<2x1x256xf32, #tpu.memory_space<vmem>>, vector<2x1x256xf32>
    %c0_8 = arith.constant 0 : index
    %c0_9 = arith.constant 0 : index
    %c0_10 = arith.constant 0 : index
    %3 = vector.load %arg4[%c0_8, %c0_9, %c0_10] : memref<2x1x256xf32, #tpu.memory_space<vmem>>, vector<2x1x256xf32>
    %cst = arith.constant 1.000000e+00 : f32
    %4 = vector.broadcast %cst : f32 to vector<2x1x256xf32>
    %5 = arith.subf %3, %4 : vector<2x1x256xf32>
    %6 = math.absf %5 : vector<2x1x256xf32>
    %7 = arith.mulf %2, %6 : vector<2x1x256xf32>
    %cst_11 = arith.constant dense<0.000000e+00> : vector<2x1xf32>
    %8 = vector.multi_reduction <add>, %7, %cst_11 [2] : vector<2x1x256xf32> to vector<2x1xf32>
    %9 = vector.shape_cast %8 : vector<2x1xf32> to vector<2x1x1xf32>
    %cst_12 = arith.constant 1.000000e-07 : f32
    %10 = vector.broadcast %cst_12 : f32 to vector<2x1x1xf32>
    %11 = arith.addf %9, %10 : vector<2x1x1xf32>
    %12 = tpu.reciprocal %11 {approx = true} : vector<2x1x1xf32> -> vector<2x1x1xf32>
    %13 = vector.broadcast %12 : vector<2x1x1xf32> to vector<2x1x256xf32>
    %14 = arith.mulf %7, %13 : vector<2x1x256xf32>
    %15 = arith.mulf %9, %12 : vector<2x1x1xf32>
    %16 = vector.broadcast %14 : vector<2x1x256xf32> to vector<2x3x256xf32>
    %17 = arith.mulf %0, %16 : vector<2x3x256xf32>
    %cst_13 = arith.constant dense<0.000000e+00> : vector<2x3xf32>
    %18 = vector.multi_reduction <add>, %17, %cst_13 [2] : vector<2x3x256xf32> to vector<2x3xf32>
    %19 = vector.shape_cast %18 : vector<2x3xf32> to vector<2x3x1xf32>
    %20 = vector.broadcast %14 : vector<2x1x256xf32> to vector<2x3x256xf32>
    %21 = arith.mulf %1, %20 : vector<2x3x256xf32>
    %cst_14 = arith.constant dense<0.000000e+00> : vector<2x3xf32>
    %22 = vector.multi_reduction <add>, %21, %cst_14 [2] : vector<2x3x256xf32> to vector<2x3xf32>
    %23 = vector.shape_cast %22 : vector<2x3xf32> to vector<2x3x1xf32>
    %cst_15 = arith.constant 1.000000e-07 : f32
    %24 = vector.broadcast %cst_15 : f32 to vector<2x1x1xf32>
    %25 = arith.addf %15, %24 : vector<2x1x1xf32>
    %cst_16 = arith.constant 1.000000e+00 : f32
    %26 = vector.broadcast %cst_16 : f32 to vector<2x1x1xf32>
    %27 = arith.divf %26, %25 : vector<2x1x1xf32>
    %28 = vector.broadcast %27 : vector<2x1x1xf32> to vector<2x3x1xf32>
    %29 = arith.mulf %19, %28 : vector<2x3x1xf32>
    %30 = vector.broadcast %27 : vector<2x1x1xf32> to vector<2x3x1xf32>
    %31 = arith.mulf %23, %30 : vector<2x3x1xf32>
    %cst_17 = arith.constant 2.000000e-07 : f32
    %32 = vector.broadcast %cst_17 : f32 to vector<2x1x1xf32>
    %33 = arith.addf %15, %32 : vector<2x1x1xf32>
    %34 = vector.extract_strided_slice %1 {offsets = [0, 0, 0], sizes = [2, 1, 256], strides = [1, 1, 1]} : vector<2x3x256xf32> to vector<2x1x256xf32>
    %35 = vector.broadcast %34 : vector<2x1x256xf32> to vector<2x3x256xf32>
    %36 = arith.mulf %17, %35 : vector<2x3x256xf32>
    %cst_18 = arith.constant dense<0.000000e+00> : vector<2x3xf32>
    %37 = vector.multi_reduction <add>, %36, %cst_18 [2] : vector<2x3x256xf32> to vector<2x3xf32>
    %38 = vector.shape_cast %37 : vector<2x3xf32> to vector<2x3x1xf32>
    %39 = vector.extract_strided_slice %31 {offsets = [0, 0, 0], sizes = [2, 1, 1], strides = [1, 1, 1]} : vector<2x3x1xf32> to vector<2x1x1xf32>
    %40 = vector.broadcast %39 : vector<2x1x1xf32> to vector<2x3x1xf32>
    %41 = arith.mulf %29, %40 : vector<2x3x1xf32>
    %42 = vector.broadcast %33 : vector<2x1x1xf32> to vector<2x3x1xf32>
    %43 = arith.mulf %41, %42 : vector<2x3x1xf32>
    %44 = arith.subf %38, %43 : vector<2x3x1xf32>
    %45 = vector.extract_strided_slice %1 {offsets = [0, 1, 0], sizes = [2, 1, 256], strides = [1, 1, 1]} : vector<2x3x256xf32> to vector<2x1x256xf32>
    %46 = vector.broadcast %45 : vector<2x1x256xf32> to vector<2x3x256xf32>
    %47 = arith.mulf %17, %46 : vector<2x3x256xf32>
    %cst_19 = arith.constant dense<0.000000e+00> : vector<2x3xf32>
    %48 = vector.multi_reduction <add>, %47, %cst_19 [2] : vector<2x3x256xf32> to vector<2x3xf32>
    %49 = vector.shape_cast %48 : vector<2x3xf32> to vector<2x3x1xf32>
    %50 = vector.extract_strided_slice %31 {offsets = [0, 1, 0], sizes = [2, 1, 1], strides = [1, 1, 1]} : vector<2x3x1xf32> to vector<2x1x1xf32>
    %51 = vector.broadcast %50 : vector<2x1x1xf32> to vector<2x3x1xf32>
    %52 = arith.mulf %29, %51 : vector<2x3x1xf32>
    %53 = vector.broadcast %33 : vector<2x1x1xf32> to vector<2x3x1xf32>
    %54 = arith.mulf %52, %53 : vector<2x3x1xf32>
    %55 = arith.subf %49, %54 : vector<2x3x1xf32>
    %56 = vector.extract_strided_slice %1 {offsets = [0, 2, 0], sizes = [2, 1, 256], strides = [1, 1, 1]} : vector<2x3x256xf32> to vector<2x1x256xf32>
    %57 = vector.broadcast %56 : vector<2x1x256xf32> to vector<2x3x256xf32>
    %58 = arith.mulf %17, %57 : vector<2x3x256xf32>
    %cst_20 = arith.constant dense<0.000000e+00> : vector<2x3xf32>
    %59 = vector.multi_reduction <add>, %58, %cst_20 [2] : vector<2x3x256xf32> to vector<2x3xf32>
    %60 = vector.shape_cast %59 : vector<2x3xf32> to vector<2x3x1xf32>
    %61 = vector.extract_strided_slice %31 {offsets = [0, 2, 0], sizes = [2, 1, 1], strides = [1, 1, 1]} : vector<2x3x1xf32> to vector<2x1x1xf32>
    %62 = vector.broadcast %61 : vector<2x1x1xf32> to vector<2x3x1xf32>
    %63 = arith.mulf %29, %62 : vector<2x3x1xf32>
    %64 = vector.broadcast %33 : vector<2x1x1xf32> to vector<2x3x1xf32>
    %65 = arith.mulf %63, %64 : vector<2x3x1xf32>
    %66 = arith.subf %60, %65 : vector<2x3x1xf32>
    %67 = tpu.concatenate %44, %55, %66 in 2 : vector<2x3x1xf32>, vector<2x3x1xf32>, vector<2x3x1xf32> -> vector<2x3x3xf32>
    %cst_21 = arith.constant 0.000000e+00 : f32
    %68 = vector.broadcast %cst_21 : f32 to vector<2x3x3xf32>
    %69 = tpu.concatenate %67, %29, %31, %68 in 2 : vector<2x3x3xf32>, vector<2x3x1xf32>, vector<2x3x1xf32>, vector<2x3x3xf32> -> vector<2x3x8xf32>
    %c0_22 = arith.constant 0 : index
    %c0_23 = arith.constant 0 : index
    %c0_24 = arith.constant 0 : index
    %70 = vector.load %arg5[%c0_22, %c0_23, %c0_24] : memref<2x3x8xf32, #tpu.memory_space<vmem>>, vector<2x3x8xf32>
    tpu.vector_store %arg5[%c0_22, %c0_23, %c0_24], %69 {strides = array<i32>} : memref<2x3x8xf32, #tpu.memory_space<vmem>>, vector<2x3x8xf32>,
    return
  }
  func.func @transform_0(%arg0: i32) -> (i32, i32, i32) {
    %c0_i32 = arith.constant 0 : i32
    %c0_i32_0 = arith.constant 0 : i32
    %c0_i32_1 = arith.constant 0 : i32
    return %arg0, %c0_i32, %c0_i32_0 : i32, i32, i32
  }
  func.func @transform_1(%arg0: i32) -> (i32, i32, i32) {
    %c0_i32 = arith.constant 0 : i32
    %c0_i32_0 = arith.constant 0 : i32
    %c0_i32_1 = arith.constant 0 : i32
    return %arg0, %c0_i32, %c0_i32_0 : i32, i32, i32
  }
  func.func @transform_2(%arg0: i32) -> (i32, i32, i32) {
    %c0_i32 = arith.constant 0 : i32
    %c0_i32_0 = arith.constant 0 : i32
    %c0_i32_1 = arith.constant 0 : i32
    return %arg0, %c0_i32, %c0_i32_0 : i32, i32, i32
  }
  func.func @transform_3(%arg0: i32) -> (i32, i32, i32) {
    %c0_i32 = arith.constant 0 : i32
    %c0_i32_0 = arith.constant 0 : i32
    %c0_i32_1 = arith.constant 0 : i32
    return %arg0, %c0_i32, %c0_i32_0 : i32, i32, i32
  }
  func.func @transform_4(%arg0: i32) -> (i32, i32, i32) {
    %c0_i32 = arith.constant 0 : i32
    %c0_i32_0 = arith.constant 0 : i32
    %c0_i32_1 = arith.constant 0 : i32
    return %arg0, %c0_i32, %c0_i32_0 : i32, i32, i32
  }
}

</mosaic_0001>

<bundles_post_ra>
// kernel: tpu_custom_call.1
= control target key start
LH: loop header
LB: loop body
LE: loop exit
PB: predicated region body
PF: predicated region fallthrough
CT: control target
= control target key end

     0   :  { %v33_v0 = vlaneseq  ;;  %vm53_vm0 = vcmask 1040384   ;;  %vm114_vm1 = vcmask 1042432   ;;  %vm401_vm2 = vcmask 7168   ;;  %s584_s2 = inlined_call_operand.vmem [shape: f32[2,1,256], index: 2, kind: input, shape index: {}]   ;;  %s585_s3 = inlined_call_operand.vmem [shape: f32[2,1,256], index: 3, kind: input, shape index: {}]   ;;  %s586_s1 = inlined_call_operand.vmem [shape: f32[2,3,256], index: 1, kind: input, shape index: {}]   ;;  %s587_s0 = inlined_call_operand.vmem [shape: f32[2,3,256], index: 0, kind: input, shape index: {}]   ;;  %s588_s4 = inlined_call_operand.vmem [shape: f32[2,3,8], index: 4, kind: output, shape index: {}]  }
   0x1   :  { %v23_v1 = vld [vmem:[%s585_s3] sm:$0x3]  ;;  %v24_v4 = vld [vmem:[%s585_s3 + $0x2] sm:$0x3]  ;;  %v20_v34 = vld [vmem:[%s586_s1 + $0x8] sm:$0x77] }
   0x2   :  { %v423_v2 = vadd.f32 -1.0, %v23_v1  ;;  %v461_v3 = vshrl.u32 %v33_v0, 7  ;;  %v21_v5 = vld [vmem:[%s584_s2] sm:$0x3]  ;;  %v424_v6 = vadd.f32 -1.0, %v24_v4  ;;  %vm404_vm3 = vcmask 15360  }
   0x3   :  { %v22_v10 = vld [vmem:[%s584_s2 + $0x2] sm:$0x3]  ;;  %vm407_vm4 = vcmask 23552   ;;  %vm410_vm5 = vcmask 31744   ;;  %vm413_vm6 = vcmask 39936   ;;  %vm416_vm7 = vcmask 59392  }
   0x4   :  { %v27_v7 = vand.u32 2147483647, %v423_v2  ;;  %v470_v8 = vsub.s32 0, %v461_v3  ;;  %v473_v9 = vsub.s32 1, %v461_v3  ;;  %v28_v11 = vand.u32 2147483647, %v424_v6 }
   0x5   :  { %v171_v28 = vsub.s32 4, %v461_v3  ;;  %v19_v29 = vld [vmem:[%s586_s1] sm:$0x77]  ;;  %v255_v30 = vsub.s32 5, %v461_v3  ;;  %v491_v31 = vsub.s32 2, %v461_v3  ;;  %v331_v32 = vsub.s32 6, %v461_v3 }
   0x6   :  { %v29_v12 = vmul.f32 %v27_v7, %v21_v5  ;;  %v30_v13 = vmul.f32 %v28_v11, %v22_v10  ;;  %v168_v35 = vrot.slane %v19_v29, %v470_v8  ;;  %v252_v39 = vrot.slane %v19_v29, %v473_v9  ;;  %v17_v54 = vld [vmem:[%s587_s0] sm:$0x77] }
   0x7   :  { %v172_v36 = vrot.slane %v19_v29, %v171_v28  ;;  %v256_v40 = vrot.slane %v19_v29, %v255_v30  ;;  %v328_v41 = vrot.slane %v19_v29, %v491_v31  ;;  %v176_v43 = vrot.slane %v20_v34, %v470_v8 }
   0x8   :  { %v36_v14 = vrot.slane %v29_v12, %v470_v8  ;;  %v40_v15 = vrot.slane %v29_v12, %v473_v9  ;;  %v44_v16 = vrot.slane %v30_v13, %v470_v8  ;;  %v48_v17 = vrot.slane %v30_v13, %v473_v9 }
   0x9   :  { %v180_v44 = vrot.slane %v20_v34, %v171_v28  ;;  %v332_v45 = vrot.slane %v19_v29, %v331_v32  ;;  %v188_v47 = vrot.slane %v168_v35, %v470_v8  ;;  %v192_v49 = vrot.slane %v172_v36, %v470_v8 }
   0xa   :  { %v54_v18 = vsel %vm53_vm0, %v36_v14, 0.0  ;;  %v55_v19 = vsel %vm53_vm0, %v40_v15, 0.0  ;;  %v59_v21 = vsel %vm53_vm0, %v44_v16, 0.0  ;;  %v60_v22 = vsel %vm53_vm0, %v48_v17, 0.0 }
   0xb   :  { %v56_v20 = vadd.f32 %v55_v19, %v54_v18  ;;  %v61_v23 = vadd.f32 %v60_v22, %v59_v21  ;;  %v272_v50 = vrot.slane %v252_v39, %v473_v9  ;;  %v276_v51 = vrot.slane %v256_v40, %v473_v9 }
   0xc   :  { %v196_v55 = vrot.slane %v176_v43, %v470_v8  ;;  %v200_v56 = vrot.slane %v180_v44, %v470_v8  ;;  %v348_v57 = vrot.slane %v328_v41, %v491_v31  ;;  %v352_v58 = vrot.slane %v332_v45, %v491_v31 }
   0xd   :  { %57 = vadd.xlane.f32.xlu0 %v56_v20  ;;  %v260_v61 = vrot.slane %v20_v34, %v473_v9  ;;  %v264_v62 = vrot.slane %v20_v34, %v255_v30  ;;  %v205_v63 = vcombine.low %v188_v47, %v192_v49  ;;  %v289_v0 = vcombine.low %v272_v50, %v276_v51 }
   0xe   :  { %v336_v1 = vrot.slane %v20_v34, %v491_v31  ;;  %v206_v6 = vcombine.low %v196_v55, %v200_v56  ;;  %v365_v7 = vcombine.low %v348_v57, %v352_v58  ;;  %v340_v10 = vrot.slane %v20_v34, %v331_v32 }
   0xf   :  { %v280_v14 = vrot.slane %v260_v61, %v473_v9  ;;  %v284_v15 = vrot.slane %v264_v62, %v473_v9 }
  0x10   :  { %v356_v19 = vrot.slane %v336_v1, %v491_v31 }
  0x11   :  { %62 = vadd.xlane.f32.xlu0 %v61_v23 }
  0x9a   :  { %v58_v24 = vpop.xlane.xlu0 %57 }
  0x9b   :  { %v64_v25 = vadd.f32 1e-07, %v58_v24 }
  0x9d   :  { %425 = vrcp.f32 %v64_v25 }
  0x9e   :  { %v482_v26 = vpop.xlane.xlu0 %62 }
  0x9f   :  { %v65_v27 = vadd.f32 1e-07, %v482_v26 }
  0xa1   :  { %427 = vrcp.f32 %v65_v27 }
  0xa7   :  { %v426_v33 = vpop.eup %425 }
  0xa8   :  { %v498_v37 = vmul.f32 %v426_v33, %v58_v24  ;;  %v73_v38 = vrot.slane %v426_v33, %v470_v8  ;;  %v360_v33 = vrot.slane %v340_v10, %v491_v31 }
  0xaa   :  { %v80_v42 = vmul.f32 %v73_v38, %v29_v12  ;;  %v290_v38 = vcombine.low %v280_v14, %v284_v15  ;;  %v366_v51 = vcombine.low %v356_v19, %v360_v33 }
  0xab   :  { %v504_v46 = vpop.eup %427 }
  0xac   :  { %v89_v48 = vrot.slane %v80_v42, %v470_v8  ;;  %v93_v52 = vrot.slane %v80_v42, %v473_v9  ;;  %v77_v53 = vrot.slane %v504_v46, %v470_v8  ;;  %v83_v10 = vmul.f32 %v504_v46, %v482_v26 }
  0xae   :  { %v102_v59 = vcombine.low %v89_v48, %v93_v52  ;;  %v81_v60 = vmul.f32 %v77_v53, %v30_v13  ;;  %v18_v13 = vld [vmem:[%s587_s0 + $0x8] sm:$0x77] }
  0xb0   :  { %v125_v2 = vmul.f32 %v102_v59, %v19_v29  ;;  %v106_v3 = vmul.f32 %v102_v59, %v17_v54  ;;  %v97_v4 = vrot.slane %v81_v60, %v470_v8  ;;  %v101_v5 = vrot.slane %v81_v60, %v473_v9 }
  0xb2   :  { %v129_v11 = vcombine.high %v125_v2, %v125_v2  ;;  %v110_v12 = vcombine.high %v106_v3, %v106_v3  ;;  %v103_v16 = vcombine.low %v97_v4, %v101_v5  ;;  %v209_v17 = vmul.f32 %v205_v63, %v106_v3 }
  0xb3   :  { %v293_v18 = vmul.f32 %v289_v0, %v106_v3  ;;  %v133_v20 = vsel %vm114_vm1, %v125_v2, 0.0  ;;  %v115_v22 = vsel %vm114_vm1, %v106_v3, 0.0  ;;  %v369_v32 = vmul.f32 %v365_v7, %v106_v3 }
  0xb4   :  { %v134_v21 = vsel %vm114_vm1, %v129_v11, 0.0  ;;  %v116_v23 = vsel %vm114_vm1, %v110_v12, 0.0  ;;  %v126_v27 = vmul.f32 %v103_v16, %v20_v34  ;;  %v107_v28 = vmul.f32 %v103_v16, %v18_v13 }
  0xb5   :  { %v135_v24 = vadd.f32 %v134_v21, %v133_v20  ;;  %v117_v25 = vadd.f32 %v116_v23, %v115_v22  ;;  %v213_v29 = vcombine.high %v209_v17, %v209_v17  ;;  %v297_v30 = vcombine.high %v293_v18, %v293_v18 }
  0xb6   :  { %v130_v35 = vcombine.high %v126_v27, %v126_v27  ;;  %v111_v36 = vcombine.high %v107_v28, %v107_v28  ;;  %v217_v39 = vsel %vm114_vm1, %v209_v17, 0.0  ;;  %v210_v41 = vmul.f32 %v206_v6, %v107_v28 }
  0xb7   :  { %136 = vadd.xlane.f32.xlu1 %v135_v24  ;;  %118 = vadd.xlane.f32.xlu0 %v117_v25  ;;  %v218_v40 = vsel %vm114_vm1, %v213_v29, 0.0  ;;  %v138_v42 = vsel %vm114_vm1, %v126_v27, 0.0  ;;  %v302_v45 = vsel %vm114_vm1, %v297_v30, 0.0  ;;  %v373_v47 = vcombine.high %v369_v32, %v369_v32 }
  0xb8   :  { %v139_v34 = vsel %vm114_vm1, %v130_v35, 0.0  ;;  %v219_v43 = vadd.f32 %v218_v40, %v217_v39  ;;  %v121_v48 = vsel %vm114_vm1, %v111_v36, 0.0  ;;  %v214_v49 = vcombine.high %v210_v41, %v210_v41 }
  0xb9   :  { %v140_v44 = vadd.f32 %v139_v34, %v138_v42  ;;  %v294_v50 = vmul.f32 %v290_v38, %v107_v28  ;;  %v301_v52 = vsel %vm114_vm1, %v293_v18, 0.0  ;;  %v120_v53 = vsel %vm114_vm1, %v107_v28, 0.0 }
  0xba   :  { %v303_v54 = vadd.f32 %v302_v45, %v301_v52  ;;  %v122_v55 = vadd.f32 %v121_v48, %v120_v53  ;;  %v378_v56 = vsel %vm114_vm1, %v373_v47, 0.0  ;;  %v223_v57 = vsel %vm114_vm1, %v214_v49, 0.0 }
  0xbb   :  { %220 = vadd.xlane.f32.xlu0 %v219_v43  ;;  %141 = vadd.xlane.f32.xlu1 %v140_v44  ;;  %v298_v58 = vcombine.high %v294_v50, %v294_v50  ;;  %v370_v59 = vmul.f32 %v366_v51, %v107_v28  ;;  %v377_v60 = vsel %vm114_vm1, %v369_v32, 0.0  ;;  %v222_v61 = vsel %vm114_vm1, %v210_v41, 0.0 }
  0xbc   :  { %v379_v62 = vadd.f32 %v378_v56, %v377_v60  ;;  %v224_v63 = vadd.f32 %v223_v57, %v222_v61  ;;  %v306_v2 = vsel %vm114_vm1, %v294_v50, 0.0  ;;  %v143_v7 = vadd.f32 1e-07, %v498_v37 }
  0xbd   :  { %v307_v0 = vsel %vm114_vm1, %v298_v58, 0.0  ;;  %v374_v1 = vcombine.high %v370_v59, %v370_v59  ;;  %v382_v5 = vsel %vm114_vm1, %v370_v59, 0.0  ;;  %v144_v11 = vadd.f32 1e-07, %v83_v10 }
  0xbe   :  { %v308_v3 = vadd.f32 %v307_v0, %v306_v2  ;;  %429 = vrcp.f32 %v143_v7  ;;  %v161_v16 = vadd.f32 2e-07, %v498_v37  ;;  %v162_v35 = vadd.f32 2e-07, %v83_v10 }
  0xbf   :  { %304 = vadd.xlane.f32.xlu0 %v303_v54  ;;  %123 = vadd.xlane.f32.xlu1 %v122_v55  ;;  %v383_v4 = vsel %vm114_vm1, %v374_v1, 0.0  ;;  %431 = vrcp.f32 %v144_v11 }
  0xc0   :  { %v384_v6 = vadd.f32 %v383_v4, %v382_v5  ;;  %v240_v46 = vrot.slane %v161_v16, %v470_v8  ;;  %v244_v50 = vrot.slane %v162_v35, %v470_v8 }
  0xc3   :  { %380 = vadd.xlane.f32.xlu0 %v379_v62  ;;  %225 = vadd.xlane.f32.xlu1 %v224_v63 }
  0xc7   :  { %309 = vadd.xlane.f32.xlu1 %v308_v3 }
  0xc8   :  { %v430_v12 = vpop.eup %429 }
  0xc9   :  { %v152_v13 = vrot.slane %v430_v12, %v470_v8  ;;  %v432_v18 = vpop.eup %431 }
  0xca   :  { %v156_v23 = vrot.slane %v432_v18, %v470_v8 }
  0xcb   :  { %385 = vadd.xlane.f32.xlu1 %v384_v6 }
 0x144   :  { %v137_v14 = vpop.xlane.xlu1 %136  ;;  %v119_v15 = vpop.xlane.xlu0 %118 }
 0x145   :  { %v159_v17 = vmul.f32 %v152_v13, %v137_v14  ;;  %v157_v19 = vmul.f32 %v152_v13, %v119_v15 }
 0x147   :  { %v230_v20 = vrot.slane %v159_v17, %v470_v8  ;;  %v314_v21 = vrot.slane %v159_v17, %v473_v9  ;;  %v390_v22 = vrot.slane %v159_v17, %v491_v31 }
 0x148   :  { %v221_v26 = vpop.xlane.xlu0 %220  ;;  %v142_v24 = vpop.xlane.xlu1 %141 }
 0x149   :  { %v235_v25 = vmul.f32 %v230_v20, %v157_v19  ;;  %v319_v27 = vmul.f32 %v314_v21, %v157_v19  ;;  %v160_v28 = vmul.f32 %v156_v23, %v142_v24  ;;  %v395_v30 = vmul.f32 %v390_v22, %v157_v19 }
 0x14b   :  { %v245_v29 = vmul.f32 %v240_v46, %v235_v25  ;;  %v321_v37 = vmul.f32 %v319_v27, %v240_v46  ;;  %v234_v40 = vrot.slane %v160_v28, %v470_v8  ;;  %v397_v41 = vmul.f32 %v395_v30, %v240_v46 }
 0x14c   :  { %v305_v32 = vpop.xlane.xlu0 %304  ;;  %v124_v33 = vpop.xlane.xlu1 %123  ;;  %v318_v42 = vrot.slane %v160_v28, %v473_v9  ;;  %v394_v49 = vrot.slane %v160_v28, %v491_v31 }
 0x14d   :  { %v247_v36 = vsub.f32 %v221_v26, %v245_v29  ;;  %v158_v38 = vmul.f32 %v156_v23, %v124_v33  ;;  %v323_v39 = vsub.f32 %v305_v32, %v321_v37 }
 0x14f   :  { %v236_v43 = vmul.f32 %v234_v40, %v158_v38  ;;  %v320_v47 = vmul.f32 %v318_v42, %v158_v38  ;;  %v402_v48 = vsel %vm401_vm2, %v247_v36, %v323_v39  ;;  %v396_v52 = vmul.f32 %v394_v49, %v158_v38 }
 0x150   :  { %v381_v34 = vpop.xlane.xlu0 %380  ;;  %v226_v44 = vpop.xlane.xlu1 %225 }
 0x151   :  { %v399_v45 = vsub.f32 %v381_v34, %v397_v41  ;;  %v246_v53 = vmul.f32 %v244_v50, %v236_v43  ;;  %v322_v55 = vmul.f32 %v320_v47, %v244_v50  ;;  %v398_v31 = vmul.f32 %v396_v52, %v244_v50 }
 0x153   :  { %v405_v51 = vsel %vm404_vm3, %v402_v48, %v399_v45  ;;  %v248_v58 = vsub.f32 %v226_v44, %v246_v53 }
 0x154   :  { %v408_v9 = vsel %vm407_vm4, %v405_v51, %v157_v19  ;;  %v310_v56 = vpop.xlane.xlu1 %309 }
 0x155   :  { %v411_v54 = vsel %vm410_vm5, %v408_v9, %v159_v17  ;;  %v324_v8 = vsub.f32 %v310_v56, %v322_v55 }
 0x156   :  { %v414_v57 = vsel %vm413_vm6, %v411_v54, 0.0 }
 0x157   :  { %417 = vst.msk [vmem:[%s588_s4] sm:$0x7] %vm416_vm7, %v414_v57  ;;  %v403_v61 = vsel %vm401_vm2, %v248_v58, %v324_v8 }
 0x158   :  { %v386_v59 = vpop.xlane.xlu1 %385 }
 0x159   :  { %v400_v60 = vsub.f32 %v386_v59, %v398_v31 }
 0x15b   :  { %v406_v62 = vsel %vm404_vm3, %v403_v61, %v400_v60 }
 0x15c   :  { %v409_v63 = vsel %vm407_vm4, %v406_v62, %v158_v38 }
 0x15d   :  { %v412_v0 = vsel %vm410_vm5, %v409_v63, %v160_v28 }
 0x15e   :  { %v415_v1 = vsel %vm413_vm6, %v412_v0, 0.0 }
 0x15f   :  { %418 = vst.msk [vmem:[%s588_s4 + $0x4] sm:$0x7] %vm416_vm7, %v415_v1 }

</bundles_post_ra>
